<compile_context>
chip_gen: v7x
topology: tpu7x:2x2x1
jax: 0.10.0
libtpu: 0.0.40
codegen_flags: <defaults>
</compile_context>

<pallas_src>
import itertools
import numpy as np
import jax
import jax.numpy as jnp
from jax.experimental import pallas as pl
from jax.experimental.pallas import tpu as pltpu

_EPS = 1e-8
_DUMMY_BOX = np.array([[0.5, 0.5, 0.2, 0.2]], np.float32)   # valid cxcywh pad box


# ---------------------------------------------------------------------------
# Pallas kernels
# ---------------------------------------------------------------------------
def _make_det_cost_kernel(w_giou):
    def kernel(logits_ref, nclass_t_ref, obox_ref, tboxt_ref, c_ref):
        # Stable softmax numerator in f32 (padded class columns hold -1e9 -> exp == 0).
        logits = logits_ref[...].astype(jnp.float32)
        mx = jnp.max(logits, axis=-1, keepdims=True)
        e = jnp.exp(logits - mx)
        inv_sum = pl.reciprocal(jnp.sum(e, axis=-1, keepdims=True), approx=False)

        # -w_class * prob[:, tgt]  ==  (e @ (-w_class * one_hot)) / sum(e)   (bf16 MXU)
        class_term = jnp.dot(e.astype(jnp.bfloat16), nclass_t_ref[...],
                             preferred_element_type=jnp.float32) * inv_sum

        ob = obox_ref[...]     # [bn, 8] : w_bbox*(cx,cy,w,h), x0,y0,x1,y1
        tbt = tboxt_ref[...]   # [8, M]  : same layout, transposed (M on lanes)

        # w_bbox * L1 cdist on cxcywh (weight already folded into both operands).
        cost_bbox = (jnp.abs(ob[:, 0:1] - tbt[0:1, :])
                     + jnp.abs(ob[:, 1:2] - tbt[1:2, :])
                     + jnp.abs(ob[:, 2:3] - tbt[2:3, :])
                     + jnp.abs(ob[:, 3:4] - tbt[3:4, :]))

        # GIoU on precomputed (unscaled) xyxy coords; preds broadcast [bn,1], targets [1,M].
        px0, py0, px1, py1 = ob[:, 4:5], ob[:, 5:6], ob[:, 6:7], ob[:, 7:8]
        tx0, ty0, tx1, ty1 = tbt[4:5, :], tbt[5:6, :], tbt[6:7, :], tbt[7:8, :]

        area_p = (px1 - px0) * (py1 - py0)   # [bn,1]
        area_t = (tx1 - tx0) * (ty1 - ty0)   # [1,M]

        ix0 = jnp.maximum(px0, tx0)
        iy0 = jnp.maximum(py0, ty0)
        ix1 = jnp.minimum(px1, tx1)
        iy1 = jnp.minimum(py1, ty1)
        inter = jnp.maximum(ix1 - ix0, 0.0) * jnp.maximum(iy1 - iy0, 0.0)
        union = area_p + area_t - inter
        iou = inter * pl.reciprocal(union + _EPS, approx=False)

        ex0 = jnp.minimum(px0, tx0)
        ey0 = jnp.minimum(py0, ty0)
        ex1 = jnp.maximum(px1, tx1)
        ey1 = jnp.maximum(py1, ty1)
        # Valid xyxy boxes (including the dummy pads) => no clamp needed on enclosing w/h.
        earea = (ex1 - ex0) * (ey1 - ey0)
        neg_giou = (earea - union) * pl.reciprocal(earea + _EPS, approx=False) - iou
        if w_giou != 1.0:                     # trace-time Python branch; skip mul if weight==1
            neg_giou = neg_giou * w_giou

        c_ref[...] = cost_bbox + class_term + neg_giou
    return kernel


def _make_rel_cost_kernel():
    def kernel(logits_ref, nmh_t_ref, obox_ref, tboxt_ref, c_ref):
        prob = jax.nn.sigmoid(logits_ref[...].astype(jnp.float32))
        # -(w_class^2) * rel_prob[:, where(tgt==1)].sum(-1)  == prob @ (-(w_class^2)*multihot)
        # (the reference applies w_class twice on this term — reproduced exactly).
        class_term = jnp.dot(prob.astype(jnp.bfloat16), nmh_t_ref[...],
                             preferred_element_type=jnp.float32)

        ob = obox_ref[...]     # [bn, 8] (only cols 0..3 = w_bbox*cxcywh used)
        tbt = tboxt_ref[...]   # [8, M]
        cost_bbox = (jnp.abs(ob[:, 0:1] - tbt[0:1, :])
                     + jnp.abs(ob[:, 1:2] - tbt[1:2, :])
                     + jnp.abs(ob[:, 2:3] - tbt[2:3, :])
                     + jnp.abs(ob[:, 3:4] - tbt[3:4, :]))

        c_ref[...] = cost_bbox + class_term
    return kernel


def _run_cost_kernel(kernel, logits, class_mat_t, obox8, tbox8_t, block_n):
    bs, n_pad, c_pad = logits.shape
    m_pad = class_mat_t.shape[-1]
    grid = (bs, n_pad // block_n)
    return pl.pallas_call(
        kernel,
        out_shape=jax.ShapeDtypeStruct((bs, n_pad, m_pad), jnp.float32),
        grid_spec=pltpu.PrefetchScalarGridSpec(
            num_scalar_prefetch=0,
            grid=grid,
            in_specs=[
                # logits (bf16): tiled over the per-image row axis
                pl.BlockSpec((None, block_n, c_pad), lambda b, i: (b, i, 0)),
                # scaled one/multi-hot (bf16): per-image, resident across row tiles
                pl.BlockSpec((None, c_pad, m_pad), lambda b, i: (b, 0, 0)),
                # pred boxes (f32): tiled over rows
                pl.BlockSpec((None, block_n, 8), lambda b, i: (b, i, 0)),
                # target boxes (f32): per-image, resident across row tiles
                pl.BlockSpec((None, 8, m_pad), lambda b, i: (b, 0, 0)),
            ],
            out_specs=pl.BlockSpec((None, block_n, m_pad), lambda b, i: (b, i, 0)),
        ),
        compiler_params=pltpu.CompilerParams(
            dimension_semantics=("parallel", "parallel"),
            vmem_limit_bytes=32 * 1024 * 1024),
    )(logits, class_mat_t, obox8, tbox8_t)


# ---------------------------------------------------------------------------
# Host-side assignment (scipy.linear_sum_assignment equivalent, O(n^3) JV)
# ---------------------------------------------------------------------------
def _linear_sum_assignment(cost):
    """Min-cost assignment via shortest augmenting paths (Jonker–Volgenant style).
    Returns (row_ind, col_ind) like scipy.optimize.linear_sum_assignment."""
    cost = np.asarray(cost, dtype=np.float64)
    n_rows, n_cols = cost.shape
    transpose = n_cols < n_rows
    a = cost.T if transpose else cost
    n, m = a.shape                      # n <= m
    u = np.zeros(n + 1)
    v = np.zeros(m + 1)
    p = np.zeros(m + 1, dtype=np.int64)   # p[j]: 1-indexed row matched to column j
    way = np.zeros(m + 1, dtype=np.int64)
    for i in range(1, n + 1):
        p[0] = i
        j0 = 0
        minv = np.full(m + 1, np.inf)
        used = np.zeros(m + 1, dtype=bool)
        while True:
            used[j0] = True
            i0 = p[j0]
            delta = np.inf
            j1 = 0
            for j in range(1, m + 1):
                if not used[j]:
                    cur = a[i0 - 1, j - 1] - u[i0] - v[j]
                    if cur < minv[j]:
                        minv[j] = cur
                        way[j] = j0
                    if minv[j] < delta:
                        delta = minv[j]
                        j1 = j
            for j in range(0, m + 1):
                if used[j]:
                    u[p[j]] += delta
                    v[j] -= delta
                else:
                    minv[j] -= delta
            j0 = j1
            if p[j0] == 0:
                break
        while True:
            j1 = way[j0]
            p[j0] = p[j1]
            j0 = j1
            if j0 == 0:
                break
    rows, cols = [], []
    for j in range(1, m + 1):
        if p[j] != 0:
            rows.append(p[j] - 1)
            cols.append(j - 1)
    rows = np.asarray(rows, dtype=np.int64)
    cols = np.asarray(cols, dtype=np.int64)
    if transpose:
        rows, cols = cols, rows
    order = np.argsort(rows)
    return rows[order], cols[order]


# ---------------------------------------------------------------------------
# Padding / layout helpers
# ---------------------------------------------------------------------------
def _next_multiple(x, m):
    return ((x + m - 1) // m) * m


def _choose_block_n(n, m_pad, c_pad, budget_bytes=14 * 1024 * 1024, max_block=1024):
    """Row-tile size (multiple of 16 for bf16 tiles) from a VMEM budget, and padded rows."""
    # Double-buffered bytes: per-image operands (one/multi-hot bf16 + target boxes f32)
    resident = 2 * (c_pad * m_pad * 2 + 8 * m_pad * 4)
    # and per-row streamed bytes (logits bf16 + pred boxes f32 + f32 output tile).
    per_row = 2 * (c_pad * 2 + 8 * 4 + m_pad * 4)
    bn_budget = (budget_bytes - resident) // per_row
    bn_budget = max(16, min(max_block, (int(bn_budget) // 16) * 16))
    # Prefer >= 2 row tiles per image (DMA/compute pipelining, megacore sharding).
    two_tiles = _next_multiple(max((n + 1) // 2, 16), 16)
    block_n = max(16, min(bn_budget, two_tiles))
    n_pad = _next_multiple(max(n, 1), block_n)
    return block_n, n_pad


def _pad_rows(x, rows, pad_value=0.0):
    pad = rows - x.shape[0]
    if pad <= 0:
        return x
    filler = jnp.full((pad,) + x.shape[1:], pad_value, x.dtype)
    return jnp.concatenate([x, filler], axis=0)


def _pad_cols(x, cols, pad_value=0.0):
    pad = cols - x.shape[1]
    if pad <= 0:
        return x
    filler = jnp.full((x.shape[0], pad), pad_value, x.dtype)
    return jnp.concatenate([x, filler], axis=1)


def _pad_rows_boxes(b, rows):
    pad = rows - b.shape[0]
    if pad <= 0:
        return b
    return jnp.concatenate([b, jnp.tile(jnp.asarray(_DUMMY_BOX), (pad, 1))], axis=0)


def _cxcywh_to_xyxy(b):
    cx, cy, w, h = b[..., 0:1], b[..., 1:2], b[..., 2:3], b[..., 3:4]
    return jnp.concatenate([cx - 0.5 * w, cy - 0.5 * h, cx + 0.5 * w, cy + 0.5 * h], axis=-1)


def _boxes8(b, w_bbox):
    """cxcywh -> [..., 8] = (w_bbox*cxcywh, xyxy): weight folded, no in-kernel conversion."""
    b = b.astype(jnp.float32)
    return jnp.concatenate([b * w_bbox, _cxcywh_to_xyxy(b)], axis=-1)


# ---------------------------------------------------------------------------
# HungarianMatcher forward
# ---------------------------------------------------------------------------
def hungarian_matcher(outputs_dict, targets,
                      cost_class=1.0, cost_bbox=1.0, cost_giou=1.0):
    outputs = outputs_dict['pred_det']
    pred_logits = outputs['pred_logits']   # [bs, nq, C]
    pred_boxes = outputs['pred_boxes']     # [bs, nq, 4]
    bs, nq, num_classes = pred_logits.shape

    sizes = [int(t['boxes'].shape[0]) for t in targets]
    m_max = max(max(sizes), 1)
    c_pad = _next_multiple(num_classes, 128)
    m_pad = _next_multiple(m_max, 128)
    block_n, nq_pad = _choose_block_n(nq, m_pad, c_pad)

    # --- det operands (per-image blocks, lane-dense, bf16 where it helps) -------------
    lf = pred_logits.astype(jnp.float32)
    lf = jnp.pad(lf, ((0, 0), (0, nq_pad - nq), (0, 0)))                    # pad rows w/ 0
    lf = jnp.pad(lf, ((0, 0), (0, 0), (0, c_pad - num_classes)),
                 constant_values=-1e9)                                      # softmax-neutral
    logits_bf = lf.astype(jnp.bfloat16)                                     # [bs, nq_pad, c_pad]

    oh_blocks, tb_blocks = [], []
    for t in targets:
        oh = jax.nn.one_hot(t['labels'], c_pad, dtype=jnp.float32) * (-cost_class)
        oh_blocks.append(_pad_rows(oh, m_pad).T)                            # [c_pad, m_pad]
        tb = _pad_rows_boxes(t['boxes'].astype(jnp.float32), m_pad)
        tb_blocks.append(_boxes8(tb, cost_bbox).T)                          # [8, m_pad]
    onehot_t = jnp.stack(oh_blocks).astype(jnp.bfloat16)                    # [bs, c_pad, m_pad]
    tbox8_t = jnp.stack(tb_blocks)                                          # [bs, 8, m_pad]

    ob = pred_boxes.astype(jnp.float32)
    if nq_pad > nq:
        ob = jnp.concatenate(
            [ob, jnp.tile(jnp.asarray(_DUMMY_BOX)[None], (bs, nq_pad - nq, 1))], axis=1)
    obox8 = _boxes8(ob, cost_bbox)                                          # [bs, nq_pad, 8]

    det_kernel = _make_det_cost_kernel(cost_giou)
    c_det_dev = _run_cost_kernel(det_kernel, logits_bf, onehot_t, obox8, tbox8_t, block_n)
    c_det_dev = c_det_dev[:, :nq, :m_max]          # device-side slice before D2H

    # --- dispatch the rel kernel BEFORE any host sync so it overlaps det Hungarian -----
    has_rel = outputs_dict.get('pred_rel') is not None
    if has_rel:
        rel_outputs = outputs_dict['pred_rel']
        rel_logits = rel_outputs['pred_logits']     # [bs, nrq, Cr]
        rel_boxes = rel_outputs['pred_boxes']       # [bs, nrq, 4]
        _, nrq, num_rel_classes = rel_logits.shape

        rel_sizes = [int(t['rel_vecs'].shape[0]) for t in targets]
        mr_max = max(max(rel_sizes), 1)
        cr_pad = _next_multiple(num_rel_classes, 128)
        mr_pad = _next_multiple(mr_max, 128)
        rblock_n, nrq_pad = _choose_block_n(nrq, mr_pad, cr_pad)

        rlf = rel_logits.astype(jnp.float32)
        rlf = jnp.pad(rlf, ((0, 0), (0, nrq_pad - nrq), (0, 0)))
        rlf = jnp.pad(rlf, ((0, 0), (0, 0), (0, cr_pad - num_rel_classes)))  # multihot pad cols=0
        rel_logits_bf = rlf.astype(jnp.bfloat16)

        mh_blocks, rtb_blocks = [], []
        class_scale = -(cost_class ** 2)   # reference applies cost_class twice on rel branch
        for t in targets:
            mh = (t['rel_labels'] == 1).astype(jnp.float32) * class_scale
            mh = _pad_rows(_pad_cols(mh, cr_pad), mr_pad)
            mh_blocks.append(mh.T)                                           # [cr_pad, mr_pad]
            rtb = _pad_rows_boxes(t['rel_vecs'].astype(jnp.float32), mr_pad)
            rtb_blocks.append(_boxes8(rtb, cost_bbox).T)                     # [8, mr_pad]
        multihot_t = jnp.stack(mh_blocks).astype(jnp.bfloat16)
        rtbox8_t = jnp.stack(rtb_blocks)

        rob = rel_boxes.astype(jnp.float32)
        if nrq_pad > nrq:
            rob = jnp.concatenate(
                [rob, jnp.tile(jnp.asarray(_DUMMY_BOX)[None], (bs, nrq_pad - nrq, 1))], axis=1)
        rel_obox8 = _boxes8(rob, cost_bbox)

        rel_kernel = _make_rel_cost_kernel()
        c_rel_dev = _run_cost_kernel(rel_kernel, rel_logits_bf, multihot_t,
                                     rel_obox8, rtbox8_t, rblock_n)
        c_rel_dev = c_rel_dev[:, :nrq, :mr_max]

    # --- det host-side assignment (rel kernel still running asynchronously) ------------
    C = np.asarray(jax.block_until_ready(c_det_dev))        # [bs, nq, m_max]
    det_indices = []
    for i, sz in enumerate(sizes):
        r, c = _linear_sum_assignment(C[i, :, :sz])
        det_indices.append((r.astype(np.int64), c.astype(np.int64)))

    result = {'det': det_indices, 'det_cost': C, 'det_sizes': sizes,
              'rel': None, 'rel_cost': None, 'rel_sizes': None}
    if not has_rel:
        return result

    relC = np.asarray(jax.block_until_ready(c_rel_dev))      # [bs, nrq, mr_max]
    rel_indices = []
    for i, sz in enumerate(rel_sizes):
        r, c = _linear_sum_assignment(relC[i, :, :sz])
        rel_indices.append((r.astype(np.int64), c.astype(np.int64)))

    result['rel'] = rel_indices
    result['rel_cost'] = relC
    result['rel_sizes'] = rel_sizes
    return result


# ---------------------------------------------------------------------------
# NumPy reference (mirrors the PyTorch math) for a sanity check
# ---------------------------------------------------------------------------
def _np_cxcywh_to_xyxy(b):
    cx, cy, w, h = b[:, 0], b[:, 1], b[:, 2], b[:, 3]
    return np.stack([cx - 0.5 * w, cy - 0.5 * h, cx + 0.5 * w, cy + 0.5 * h], -1)


def _np_giou(b1, b2):
    a1 = (b1[:, 2] - b1[:, 0]) * (b1[:, 3] - b1[:, 1])
    a2 = (b2[:, 2] - b2[:, 0]) * (b2[:, 3] - b2[:, 1])
    lt = np.maximum(b1[:, None, :2], b2[None, :, :2])
    rb = np.minimum(b1[:, None, 2:], b2[None, :, 2:])
    wh = np.clip(rb - lt, 0, None)
    inter = wh[..., 0] * wh[..., 1]
    union = a1[:, None] + a2[None, :] - inter
    iou = inter / union
    elt = np.minimum(b1[:, None, :2], b2[None, :, :2])
    erb = np.maximum(b1[:, None, 2:], b2[None, :, 2:])
    ewh = np.clip(erb - elt, 0, None)
    ea = ewh[..., 0] * ewh[..., 1]
    return iou - (ea - union) / ea


def _np_det_cost(logits, tgt_ids, obox, tbox, wc, wb, wg):
    x = logits - logits.max(-1, keepdims=True)
    p = np.exp(x)
    p = p / p.sum(-1, keepdims=True)
    cc = -p[:, tgt_ids]
    cb = np.abs(obox[:, None, :] - tbox[None, :, :]).sum(-1)
    cg = -_np_giou(_np_cxcywh_to_xyxy(obox), _np_cxcywh_to_xyxy(tbox))
    return wb * cb + wc * cc + wg * cg


def _np_rel_cost(logits, multihot, obox, tbox, wc, wb):
    p = 1.0 / (1.0 + np.exp(-logits))
    cc = -(p @ multihot.T) * wc
    cb = np.abs(obox[:, None, :] - tbox[None, :, :]).sum(-1)
    return wb * cb + wc * cc


def _brute_force_min(cost):
    cost = np.asarray(cost, np.float64)
    if cost.shape[0] < cost.shape[1]:
        cost = cost.T
    n_r, n_c = cost.shape
    best = np.inf
    for rows in itertools.permutations(range(n_r), n_c):
        s = cost[list(rows), range(n_c)].sum()
        if s < best:
            best = s
    return best


# ---------------------------------------------------------------------------
if __name__ == "__main__":
    key = jax.random.PRNGKey(0)
    ks = jax.random.split(key, 12)

    bs, nq, num_classes = 2, 8, 16
    nrq, num_rel_classes = 8, 16
    sizes = [3, 2]
    rel_sizes = [2, 3]

    pred_logits = jax.random.normal(ks[0], (bs, nq, num_classes), jnp.float32)
    pred_boxes = jax.random.uniform(ks[1], (bs, nq, 4), jnp.float32, 0.1, 0.6)
    rel_pred_logits = jax.random.normal(ks[2], (bs, nrq, num_rel_classes), jnp.float32)
    rel_pred_boxes = jax.random.uniform(ks[3], (bs, nrq, 4), jnp.float32, 0.1, 0.6)

    targets = []
    kidx = 4
    for b in range(bs):
        n, nr = sizes[b], rel_sizes[b]
        labels = jax.random.randint(ks[kidx], (n,), 0, num_classes); kidx += 1
        boxes = jax.random.uniform(ks[kidx], (n, 4), jnp.float32, 0.1, 0.6); kidx += 1
        rel_labels = (jax.random.uniform(ks[kidx], (nr, num_rel_classes))
                      < 0.3).astype(jnp.float32)
        rel_vecs = jax.random.uniform(ks[kidx + 1], (nr, 4), jnp.float32, 0.1, 0.6)
        kidx += 2
        targets.append({'labels': labels, 'boxes': boxes,
                        'rel_labels': rel_labels, 'rel_vecs': rel_vecs})

    outputs_dict = {
        'pred_det': {'pred_logits': pred_logits, 'pred_boxes': pred_boxes},
        'pred_rel': {'pred_logits': rel_pred_logits, 'pred_boxes': rel_pred_boxes},
    }

    out = hungarian_matcher(outputs_dict, targets,
                            cost_class=1.0, cost_bbox=1.0, cost_giou=1.0)

    # --- sanity check of the per-image (block-diagonal) cost blocks vs NumPy reference ---
    for i in range(bs):
        sz = sizes[i]
        ref = _np_det_cost(np.asarray(pred_logits[i]), np.asarray(targets[i]['labels']),
                           np.asarray(pred_boxes[i]), np.asarray(targets[i]['boxes']),
                           1.0, 1.0, 1.0)
        assert np.allclose(out['det_cost'][i][:, :sz], ref, atol=5e-2), "det cost mismatch"

        rsz = rel_sizes[i]
        rref = _np_rel_cost(np.asarray(rel_pred_logits[i]),
                            np.asarray((targets[i]['rel_labels'] == 1).astype(jnp.float32)),
                            np.asarray(rel_pred_boxes[i]), np.asarray(targets[i]['rel_vecs']),
                            1.0, 1.0)
        assert np.allclose(out['rel_cost'][i][:, :rsz], rref, atol=5e-2), "rel cost mismatch"

    # --- assignment sanity: lengths + optimality of the JV solver vs brute force ---------
    for i, (r, c) in enumerate(out['det']):
        sz = sizes[i]
        assert len(r) == len(c) == min(nq, sz)
        blk = out['det_cost'][i][:, :sz].astype(np.float64)
        assert np.isclose(blk[r, c].sum(), _brute_force_min(blk), rtol=1e-6), "det assignment"
    for i, (r, c) in enumerate(out['rel']):
        rsz = rel_sizes[i]
        assert len(r) == len(c) == min(nrq, rsz)
        blk = out['rel_cost'][i][:, :rsz].astype(np.float64)
        assert np.isclose(blk[r, c].sum(), _brute_force_min(blk), rtol=1e-6), "rel assignment"

    print("KERNEL_OK")
</pallas_src>

<mosaic_0001>
module attributes {stable_mosaic.version = 11 : i64} {
  func.func @kernel(%arg0: i32, %arg1: i32, %arg2: memref<1x16x128xbf16, #tpu.memory_space<vmem>>, %arg3: memref<1x128x128xbf16, #tpu.memory_space<vmem>>, %arg4: memref<1x16x8xf32, #tpu.memory_space<vmem>>, %arg5: memref<1x8x128xf32, #tpu.memory_space<vmem>>, %arg6: memref<1x16x128xf32, #tpu.memory_space<vmem>>) attributes {dimension_semantics = [#tpu.dimension_semantics<parallel>, #tpu.dimension_semantics<parallel>], iteration_bounds = array<i64: 2, 1>, scalar_prefetch = 0 : i64, scratch_operands = 0 : i64, tpu.core_type = #tpu.core_type<tc>, window_params = [{transform_indices = @transform_0, window_bounds = array<i64: 1, 16, 128>}, {transform_indices = @transform_1, window_bounds = array<i64: 1, 128, 128>}, {transform_indices = @transform_2, window_bounds = array<i64: 1, 16, 8>}, {transform_indices = @transform_3, window_bounds = array<i64: 1, 8, 128>}, {transform_indices = @transform_4, window_bounds = array<i64: 1, 16, 128>}]} {
    %c0 = arith.constant 0 : index
    %c0_0 = arith.constant 0 : index
    %c0_1 = arith.constant 0 : index
    %0 = vector.load %arg2[%c0, %c0_0, %c0_1] : memref<1x16x128xbf16, #tpu.memory_space<vmem>>, vector<1x16x128xbf16>
    %1 = vector.shape_cast %0 : vector<1x16x128xbf16> to vector<16x128xbf16>
    %2 = arith.extf %1 : vector<16x128xbf16> to vector<16x128xf32>
    %cst = arith.constant dense<0xFF800000> : vector<16xf32>
    %3 = vector.multi_reduction <maximumf>, %2, %cst [1] : vector<16x128xf32> to vector<16xf32>
    %4 = vector.shape_cast %3 : vector<16xf32> to vector<16x1xf32>
    %5 = vector.broadcast %4 : vector<16x1xf32> to vector<16x128xf32>
    %6 = arith.subf %2, %5 : vector<16x128xf32>
    %7 = math.exp %6 : vector<16x128xf32>
    %cst_2 = arith.constant dense<0.000000e+00> : vector<16xf32>
    %8 = vector.multi_reduction <add>, %7, %cst_2 [1] : vector<16x128xf32> to vector<16xf32>
    %9 = vector.shape_cast %8 : vector<16xf32> to vector<16x1xf32>
    %10 = tpu.reciprocal %9 : vector<16x1xf32> -> vector<16x1xf32>
    %11 = arith.truncf %7 : vector<16x128xf32> to vector<16x128xbf16>
    %c0_3 = arith.constant 0 : index
    %c0_4 = arith.constant 0 : index
    %c0_5 = arith.constant 0 : index
    %12 = vector.load %arg3[%c0_3, %c0_4, %c0_5] : memref<1x128x128xbf16, #tpu.memory_space<vmem>>, vector<1x128x128xbf16>
    %13 = vector.shape_cast %12 : vector<1x128x128xbf16> to vector<128x128xbf16>
    %cst_6 = arith.constant dense<0.000000e+00> : vector<16x128xf32>
    %14 = tpu.matmul %11, %13, %cst_6 {dimension_numbers = #tpu.dot_dimension_numbers<[1], [0], [0], [1], [0, 0, 1, 1], [], []>} : vector<16x128xbf16>, vector<128x128xbf16>, vector<16x128xf32> -> vector<16x128xf32>
    %15 = vector.broadcast %10 : vector<16x1xf32> to vector<16x128xf32>
    %16 = arith.mulf %14, %15 : vector<16x128xf32>
    %c0_7 = arith.constant 0 : index
    %c0_8 = arith.constant 0 : index
    %c0_9 = arith.constant 0 : index
    %17 = vector.load %arg4[%c0_7, %c0_8, %c0_9] : memref<1x16x8xf32, #tpu.memory_space<vmem>>, vector<1x16x8xf32>
    %18 = vector.shape_cast %17 : vector<1x16x8xf32> to vector<16x8xf32>
    %c0_10 = arith.constant 0 : index
    %c0_11 = arith.constant 0 : index
    %c0_12 = arith.constant 0 : index
    %19 = vector.load %arg5[%c0_10, %c0_11, %c0_12] : memref<1x8x128xf32, #tpu.memory_space<vmem>>, vector<1x8x128xf32>
    %20 = vector.shape_cast %19 : vector<1x8x128xf32> to vector<8x128xf32>
    %21 = vector.extract_strided_slice %18 {offsets = [0, 0], sizes = [16, 1], strides = [1, 1]} : vector<16x8xf32> to vector<16x1xf32>
    %22 = vector.extract_strided_slice %20 {offsets = [0, 0], sizes = [1, 128], strides = [1, 1]} : vector<8x128xf32> to vector<1x128xf32>
    %23 = vector.broadcast %21 : vector<16x1xf32> to vector<16x128xf32>
    %24 = vector.broadcast %22 : vector<1x128xf32> to vector<16x128xf32>
    %25 = arith.subf %23, %24 : vector<16x128xf32>
    %26 = math.absf %25 : vector<16x128xf32>
    %27 = vector.extract_strided_slice %18 {offsets = [0, 1], sizes = [16, 1], strides = [1, 1]} : vector<16x8xf32> to vector<16x1xf32>
    %28 = vector.extract_strided_slice %20 {offsets = [1, 0], sizes = [1, 128], strides = [1, 1]} : vector<8x128xf32> to vector<1x128xf32>
    %29 = vector.broadcast %27 : vector<16x1xf32> to vector<16x128xf32>
    %30 = vector.broadcast %28 : vector<1x128xf32> to vector<16x128xf32>
    %31 = arith.subf %29, %30 : vector<16x128xf32>
    %32 = math.absf %31 : vector<16x128xf32>
    %33 = arith.addf %26, %32 : vector<16x128xf32>
    %34 = vector.extract_strided_slice %18 {offsets = [0, 2], sizes = [16, 1], strides = [1, 1]} : vector<16x8xf32> to vector<16x1xf32>
    %35 = vector.extract_strided_slice %20 {offsets = [2, 0], sizes = [1, 128], strides = [1, 1]} : vector<8x128xf32> to vector<1x128xf32>
    %36 = vector.broadcast %34 : vector<16x1xf32> to vector<16x128xf32>
    %37 = vector.broadcast %35 : vector<1x128xf32> to vector<16x128xf32>
    %38 = arith.subf %36, %37 : vector<16x128xf32>
    %39 = math.absf %38 : vector<16x128xf32>
    %40 = arith.addf %33, %39 : vector<16x128xf32>
    %41 = vector.extract_strided_slice %18 {offsets = [0, 3], sizes = [16, 1], strides = [1, 1]} : vector<16x8xf32> to vector<16x1xf32>
    %42 = vector.extract_strided_slice %20 {offsets = [3, 0], sizes = [1, 128], strides = [1, 1]} : vector<8x128xf32> to vector<1x128xf32>
    %43 = vector.broadcast %41 : vector<16x1xf32> to vector<16x128xf32>
    %44 = vector.broadcast %42 : vector<1x128xf32> to vector<16x128xf32>
    %45 = arith.subf %43, %44 : vector<16x128xf32>
    %46 = math.absf %45 : vector<16x128xf32>
    %47 = arith.addf %40, %46 : vector<16x128xf32>
    %48 = vector.extract_strided_slice %18 {offsets = [0, 4], sizes = [16, 1], strides = [1, 1]} : vector<16x8xf32> to vector<16x1xf32>
    %49 = vector.extract_strided_slice %18 {offsets = [0, 5], sizes = [16, 1], strides = [1, 1]} : vector<16x8xf32> to vector<16x1xf32>
    %50 = vector.extract_strided_slice %18 {offsets = [0, 6], sizes = [16, 1], strides = [1, 1]} : vector<16x8xf32> to vector<16x1xf32>
    %51 = vector.extract_strided_slice %18 {offsets = [0, 7], sizes = [16, 1], strides = [1, 1]} : vector<16x8xf32> to vector<16x1xf32>
    %52 = vector.extract_strided_slice %20 {offsets = [4, 0], sizes = [1, 128], strides = [1, 1]} : vector<8x128xf32> to vector<1x128xf32>
    %53 = vector.extract_strided_slice %20 {offsets = [5, 0], sizes = [1, 128], strides = [1, 1]} : vector<8x128xf32> to vector<1x128xf32>
    %54 = vector.extract_strided_slice %20 {offsets = [6, 0], sizes = [1, 128], strides = [1, 1]} : vector<8x128xf32> to vector<1x128xf32>
    %55 = vector.extract_strided_slice %20 {offsets = [7, 0], sizes = [1, 128], strides = [1, 1]} : vector<8x128xf32> to vector<1x128xf32>
    %56 = arith.subf %50, %48 : vector<16x1xf32>
    %57 = arith.subf %51, %49 : vector<16x1xf32>
    %58 = arith.mulf %56, %57 : vector<16x1xf32>
    %59 = arith.subf %54, %52 : vector<1x128xf32>
    %60 = arith.subf %55, %53 : vector<1x128xf32>
    %61 = arith.mulf %59, %60 : vector<1x128xf32>
    %62 = vector.broadcast %48 : vector<16x1xf32> to vector<16x128xf32>
    %63 = vector.broadcast %52 : vector<1x128xf32> to vector<16x128xf32>
    %64 = arith.maximumf %62, %63 : vector<16x128xf32>
    %65 = vector.broadcast %49 : vector<16x1xf32> to vector<16x128xf32>
    %66 = vector.broadcast %53 : vector<1x128xf32> to vector<16x128xf32>
    %67 = arith.maximumf %65, %66 : vector<16x128xf32>
    %68 = vector.broadcast %50 : vector<16x1xf32> to vector<16x128xf32>
    %69 = vector.broadcast %54 : vector<1x128xf32> to vector<16x128xf32>
    %70 = arith.minimumf %68, %69 : vector<16x128xf32>
    %71 = vector.broadcast %51 : vector<16x1xf32> to vector<16x128xf32>
    %72 = vector.broadcast %55 : vector<1x128xf32> to vector<16x128xf32>
    %73 = arith.minimumf %71, %72 : vector<16x128xf32>
    %74 = arith.subf %70, %64 : vector<16x128xf32>
    %cst_13 = arith.constant 0.000000e+00 : f32
    %75 = vector.broadcast %cst_13 : f32 to vector<16x128xf32>
    %76 = arith.maximumf %74, %75 : vector<16x128xf32>
    %77 = arith.subf %73, %67 : vector<16x128xf32>
    %cst_14 = arith.constant 0.000000e+00 : f32
    %78 = vector.broadcast %cst_14 : f32 to vector<16x128xf32>
    %79 = arith.maximumf %77, %78 : vector<16x128xf32>
    %80 = arith.mulf %76, %79 : vector<16x128xf32>
    %81 = vector.broadcast %58 : vector<16x1xf32> to vector<16x128xf32>
    %82 = vector.broadcast %61 : vector<1x128xf32> to vector<16x128xf32>
    %83 = arith.addf %81, %82 : vector<16x128xf32>
    %84 = arith.subf %83, %80 : vector<16x128xf32>
    %cst_15 = arith.constant 9.99999993E-9 : f32
    %85 = vector.broadcast %cst_15 : f32 to vector<16x128xf32>
    %86 = arith.addf %84, %85 : vector<16x128xf32>
    %87 = tpu.reciprocal %86 : vector<16x128xf32> -> vector<16x128xf32>
    %88 = arith.mulf %80, %87 : vector<16x128xf32>
    %89 = vector.broadcast %48 : vector<16x1xf32> to vector<16x128xf32>
    %90 = vector.broadcast %52 : vector<1x128xf32> to vector<16x128xf32>
    %91 = arith.minimumf %89, %90 : vector<16x128xf32>
    %92 = vector.broadcast %49 : vector<16x1xf32> to vector<16x128xf32>
    %93 = vector.broadcast %53 : vector<1x128xf32> to vector<16x128xf32>
    %94 = arith.minimumf %92, %93 : vector<16x128xf32>
    %95 = vector.broadcast %50 : vector<16x1xf32> to vector<16x128xf32>
    %96 = vector.broadcast %54 : vector<1x128xf32> to vector<16x128xf32>
    %97 = arith.maximumf %95, %96 : vector<16x128xf32>
    %98 = vector.broadcast %51 : vector<16x1xf32> to vector<16x128xf32>
    %99 = vector.broadcast %55 : vector<1x128xf32> to vector<16x128xf32>
    %100 = arith.maximumf %98, %99 : vector<16x128xf32>
    %101 = arith.subf %97, %91 : vector<16x128xf32>
    %102 = arith.subf %100, %94 : vector<16x128xf32>
    %103 = arith.mulf %101, %102 : vector<16x128xf32>
    %104 = arith.subf %103, %84 : vector<16x128xf32>
    %cst_16 = arith.constant 9.99999993E-9 : f32
    %105 = vector.broadcast %cst_16 : f32 to vector<16x128xf32>
    %106 = arith.addf %103, %105 : vector<16x128xf32>
    %107 = tpu.reciprocal %106 : vector<16x128xf32> -> vector<16x128xf32>
    %108 = arith.mulf %104, %107 : vector<16x128xf32>
    %109 = arith.subf %108, %88 : vector<16x128xf32>
    %110 = arith.addf %47, %16 : vector<16x128xf32>
    %111 = arith.addf %110, %109 : vector<16x128xf32>
    %c0_17 = arith.constant 0 : index
    %c0_18 = arith.constant 0 : index
    %c0_19 = arith.constant 0 : index
    %112 = vector.load %arg6[%c0_17, %c0_18, %c0_19] : memref<1x16x128xf32, #tpu.memory_space<vmem>>, vector<1x16x128xf32>
    %113 = vector.shape_cast %112 : vector<1x16x128xf32> to vector<16x128xf32>
    %114 = vector.shape_cast %111 : vector<16x128xf32> to vector<1x16x128xf32>
    tpu.vector_store %arg6[%c0_17, %c0_18, %c0_19], %114 {strides = array<i32>} : memref<1x16x128xf32, #tpu.memory_space<vmem>>, vector<1x16x128xf32>,
    return
  }
  func.func @transform_0(%arg0: i32, %arg1: i32) -> (i32, i32, i32) {
    %c0_i32 = arith.constant 0 : i32
    %c0_i32_0 = arith.constant 0 : i32
    return %arg0, %arg1, %c0_i32 : i32, i32, i32
  }
  func.func @transform_1(%arg0: i32, %arg1: i32) -> (i32, i32, i32) {
    %c0_i32 = arith.constant 0 : i32
    %c0_i32_0 = arith.constant 0 : i32
    %c0_i32_1 = arith.constant 0 : i32
    return %arg0, %c0_i32, %c0_i32_0 : i32, i32, i32
  }
  func.func @transform_2(%arg0: i32, %arg1: i32) -> (i32, i32, i32) {
    %c0_i32 = arith.constant 0 : i32
    %c0_i32_0 = arith.constant 0 : i32
    return %arg0, %arg1, %c0_i32 : i32, i32, i32
  }
  func.func @transform_3(%arg0: i32, %arg1: i32) -> (i32, i32, i32) {
    %c0_i32 = arith.constant 0 : i32
    %c0_i32_0 = arith.constant 0 : i32
    %c0_i32_1 = arith.constant 0 : i32
    return %arg0, %c0_i32, %c0_i32_0 : i32, i32, i32
  }
  func.func @transform_4(%arg0: i32, %arg1: i32) -> (i32, i32, i32) {
    %c0_i32 = arith.constant 0 : i32
    %c0_i32_0 = arith.constant 0 : i32
    return %arg0, %arg1, %c0_i32 : i32, i32, i32
  }
}

</mosaic_0001>

<bundles_post_ra>
// kernel: tpu_custom_call.1
= control target key start
LH: loop header
LB: loop body
LE: loop exit
PB: predicated region body
PF: predicated region fallthrough
CT: control target
= control target key end

     0   :  { %9 = vsyncpa [#allocation3], 0  ;;  %s1469_s0 = inlined_call_operand.vmem [shape: bf16[2,16,128], index: 0, kind: input, shape index: {}]   ;;  %s1470_s1 = inlined_call_operand.hbm [shape: bf16[2,128,128], index: 1, kind: input, shape index: {}]   ;;  %s1471_s2 = inlined_call_operand.vmem [shape: f32[2,16,8], index: 2, kind: input, shape index: {}]   ;;  %s1472_s3 = inlined_call_operand.vmem [shape: f32[2,8,128], index: 3, kind: input, shape index: {}]   ;;  %s1473_s4 = inlined_call_operand.hbm [shape: f32[2,16,128], index: 4, kind: output, shape index: {}]  }
   0x1   :  { %11 = vsyncpa [#allocation3 + $0x1], 0 }
   0x2   :  { %12 = vsyncpa [#allocation4], 0 }
   0x3   :  { %14 = vsyncpa [#allocation4 + $0x1], 0  ;;  %s1156_s15 = smov 0   ;;  %s1158_s16 = smov 0  }
   0x4   :  { %s1160_s17 = smov 0   ;;  %s1162_s18 = smov 0  }
   0x5   :  { %s1164_s19 = smov 0   ;;  %s1166_s20 = smov 0  }
   0x6 LB: > { %s818_s21 = sadd.s32 4294967295, %s1111_s20   ;;  %s819_s22 = sadd.s32 4294967294, %s1111_s20   ;;  %s1111_s20 = sphi %s1166_s20, %s20_s20   ;;  %s1107_s19 = sphi %s1164_s19, %s1488_s19   ;;  %s1103_s18 = sphi %s1162_s18, %s1487_s18   ;;  %s1099_s17 = sphi %s1160_s17, %s1486_s17   ;;  %s1095_s16 = sphi %s1158_s16, %s1485_s16   ;;  %s1091_s15 = sphi %s1156_s15, %s1484_s15  }
   0x7   : > { %s32_s23 = sadd.s32 1, %s1107_s19  ;;  %s67_s24 = sadd.s32 1, %s1099_s17 }
   0x8   : > { %p34_p0 = scmp.ge.s32.totalorder %s32_s23, 2  ;;  %p74_p1 = scmp.ne.s32.totalorder %s1099_s17, %s1095_s16 }
   0x9   : > { %p75_p2 = scmp.eq.s32.totalorder %s1111_s20, 0  ;;  %p80_p3 = scmp.ne.s32.totalorder %s1095_s16, %s1091_s15 }
   0xa   : > { %s1490_s23 = smov (%p34_p0, %s32_s23), 0  ;;  %p81_p5 = scmp.eq.s32.totalorder %s818_s21, 0 }
   0xb   : > { %p1197_p4 = por %p75_p2, %p74_p1  ;;  %s64_s26 = ssub.s32 %s1107_s19, %s1490_s23 }
   0xc   : > { %p160_p6 = scmp.eq.s32.totalorder %s818_s21, 1  ;;  %p65_p7 = scmp.eq.s32.totalorder %s64_s26, 0 }
   0xd   : > { %p1203_p8 = por %p81_p5, %p80_p3  ;;  %p166_p10 = scmp.eq.s32.totalorder %s819_s22, 1 }
   0xe   : > { %p1207_p9 = por %p160_p6, %p74_p1  ;;  %p895_p13 = scmp.lt.s32.totalorder %s1111_s20, 2 }
   0xf   : > { %s1212_s29 = scalar_select %p65_p7, %s1099_s17, %s67_s24  }
  0x10   : > { %s1477_s28 = scalar_select %p1207_p9, 1, 0 }
  0x11   : > { %p1214_p11 = por %p166_p10, %p80_p3  ;;  %s199_s5 = sand.u32 1, %s1099_s17  }
  0x12   : > { %s822_s6 = sshll.u32 %s199_s5, 6  ;;  %s846_s7 = sshll.u32 %s1107_s19, 10 }
  0x13   : > { %s1478_s30 = scalar_select %p1214_p11, 1, 0 }
  0x14   : > { %s1225_s10 = scalar_lea.hbm %s1470_s1, %s846_s7  ;;  %s203_s11 = scalar_lea.vmem [#allocation2], %s822_s6 }
  0x15   : > { %s210_s12 = sshll.u32 %s203_s11, 4  ;;  %p1231_p0 = pnand %p895_p13, %p1197_p4  ;;  %s1227_s12 = int_to_ptr.vmem [resolvable:$true] %s210_s12 }
  0x16   : > { %s1236_s14 = scalar_lea.sflag [#allocation3], %s199_s5  ;;  %s999_s21 = scalar_lea.hbm %s1225_s10, 1024 }
  0x17   : > { %p1000_p2 = scmp.ne.s32.totalorder %s1225_s10, %s999_s21  ;;  %p1001_p3 = pneg %p1231_p0 }
  0x18   : > { %s1004_s25 = scalar_lea.hbm %s1470_s1, 2048  ;;  %p1005_p4 = scmp.lt.u32.totalorder %s1225_s10, %s1470_s1 }
  0x19   : > { %p1002_p5 = pnand %p1001_p3, %p1000_p2  ;;  %p1006_p7 = scmp.lt.u32.totalorder %s1004_s25, %s999_s21 }
  0x1a   : > { %p1008_p13 = scmp.lt.u32.totalorder %s999_s21, %s1225_s10 }
  0x1b   : > { %p1003_p6 = pneg %p1002_p5  ;;  %p1007_p10 = por %p1006_p7, %p1005_p4 }
  0x1d   : > { %p1009_p12 = por %p1008_p13, %p1007_p10 }
  0x1f   : > { %p1010_p1 = pnand %p1009_p12, %p1003_p6 }
  0x21   : > { %1013 = shalt.err (!%p1010_p1)
}
  0x22   : > { %s1014_s5 = scalar_lea.vmem %s1227_s12, 1024  ;;  %s1113_s7 = smov [#allocation2]  }
  0x23   : > { %p1015_p2 = scmp.ne.s32.totalorder %s1227_s12, %s1014_s5  ;;  %s1019_s8 = sshll.u32 %s1113_s7, 4  ;;  %s1020_s8 = int_to_ptr.vmem [resolvable:$false] %s1019_s8 }
  0x24   : > { %s1021_s9 = scalar_lea.vmem %s1020_s8, 2048  ;;  %p1022_p9 = scmp.lt.s32.totalorder %s1227_s12, %s1020_s8 }
  0x25   : > { %p1017_p5 = pnand %p1015_p2, %p1001_p3  ;;  %p1023_p4 = scmp.lt.s32.totalorder %s1021_s9, %s1014_s5 }
  0x27   : > { %p1018_p11 = pneg %p1017_p5  ;;  %p1024_p7 = por %p1023_p4, %p1022_p9 }
  0x29   : > { %p1025_p10 = pnand %p1024_p7, %p1018_p11 }
  0x2b   : > { %1028 = shalt.err (!%p1025_p10)
}
  0x2c   : > { %s1114_s11 = smov 64   ;;  %s1115_s21 = smov 4  }
  0x2d   : > { %890 = dma.hbm_to_vmem [thread:$0]  (!%p1231_p0), %s1225_s10, 1024, %s1227_s12, %s1236_s14, %s1114_s11, %s1114_s11, %s1115_s21  }
  0x2e   : > { %p238_p12 = scmp.lt.s32.totalorder %s1111_s20, 3  ;;  %p1480_p1 = scmp.ge.s32.totalorder %s1111_s20, 1 }
  0x30   : > { %p239_p3 = pnand %p1480_p1, %p238_p12 }
  0x31   : > { %s1268_s22 = sand.u32 (!%p239_p3), 1, %s1095_s16  }
  0x32   : > { %242 = sbr.rel (%p239_p3) target bundleno = 475 (0x1db), region = 36  ;;  %s826_s24 = sshll.u32 (!%p239_p3), %s1268_s22, 6 }
  0x33   : > { %s245_s25 = scalar_lea.sflag (!%p239_p3), [#allocation3], %s1268_s22  ;;  %s1272_s26 = scalar_lea.vmem (!%p239_p3), [#allocation2], %s826_s24 }
  0x39   : > { %1082 = dma.done.wait (%p1203_p8), %s245_s25, 1024  }
  0x3a   : > { %1084 = vsyncadd (%p1203_p8), %s245_s25, 4294966272  ;;  %p296_p9 = scmp.lt.s32.totalorder %s1103_s18, 1  ;;  %v1116_v0 = vmov 4   ;;  %v1117_v1 = vmov 0   ;;  %v1118_v2 = vmov 0.0   ;;  %s1119_s9 = smov 2   ;;  %v462_v23 = vlaneseq }
  0x3b   : > { %961 = vset.pattern.permute.xlu1 %v1116_v0  ;;  %965 = vset.pattern.permute.xlu0 %v1117_v1  ;;  %v975_v7 = vld [vmem:[%s1272_s26] sm:$0xff]   ;;  %v976_v9 = vld [vmem:[%s1272_s26 + $0x8] sm:$0xff]   ;;  %v977_v10 = vld [vmem:[%s1272_s26 + $0x10] sm:$0xff]   ;;  %v1120_v11 = vmov 5   ;;  %v1121_v15 = vmov 6   ;;  %vm1122_vm0 = vmmov 0  }
  0x3c   : > { %s1280_s10 = scalar_select %p296_p9, %s1103_s18, 1  ;;  %863 = vmatprep.subr.bf16.mxu0 %v1118_v2  ;;  %v978_v12 = vld [vmem:[%s1272_s26 + $0x18] sm:$0xff]   ;;  %v979_v13 = vld [vmem:[%s1272_s26 + $0x20] sm:$0xff]   ;;  %v980_v14 = vld [vmem:[%s1272_s26 + $0x28] sm:$0xff]   ;;  %879 = vmatprep.mubr.msk.bf16.mxu0 %vm1122_vm0, %v1118_v2  ;;  %v1123_v17 = vmov 7   ;;  %v1333_v24 = vshrl.u32 %v462_v23, 7 }
  0x3d   : > { %864 = vmatpush3.bf16.msra.mxu0 %v975_v7  ;;  %v981_v16 = vld [vmem:[%s1272_s26 + $0x30] sm:$0xff]   ;;  %v982_v18 = vld [vmem:[%s1272_s26 + $0x38] sm:$0xff]   ;;  %s1124_s11 = smov 127   ;;  %s827_s26 = sshll.u32 %s1268_s22, 4 }
  0x3e   : > { %s848_s12 = sshll.u32 %s1280_s10, 4  ;;  %s847_s13 = sshll.u32 %s1280_s10, 3  ;;  %865 = vmatprep.subr.bf16.mxu0 %v1118_v2  ;;  %v560_v25 = vsub.s32 4, %v1333_v24  ;;  %v574_v31 = vsub.s32 5, %v1333_v24  ;;  %v588_v42 = vsub.s32 6, %v1333_v24  ;;  %v602_v50 = vsub.s32 7, %v1333_v24 }
  0x3f   : > { %s313_s6 = scalar_lea.vmem %s1471_s2, %s848_s12  ;;  %s303_s8 = scalar_lea.vmem %s1469_s0, %s847_s13 }
  0x40   : > { %v1292_v3 = vld [vmem:[%s313_s6] sm:$0xff]  ;;  %v1298_v6 = vld [vmem:[%s313_s6 + $0x8] sm:$0xff]  ;;  %s318_s25 = scalar_lea.vmem %s1472_s3, %s847_s13  ;;  %s294_s10 = scalar_lea.vmem [#allocation5], %s827_s26 }
  0x41   : > { %v1294_v4 = vld [vmem:[%s303_s8] sm:$0xff]   ;;  %524 = vrot.lane.b32.xlu1 %v1292_v3, %s1119_s9  ;;  %866 = vmatpush3.bf16.msra.mxu0 %v976_v9  ;;  %s849_s12 = sshll.u32 %s1103_s18, 8  ;;  %s686_s13 = sshll.u32 %s294_s10, 4  ;;  %s1420_s13 = int_to_ptr.vmem [resolvable:$true] %s686_s13 }
  0x42   : > { %v852_v5 = vunpack.c.l.bf16 %v1294_v4  ;;  %v853_v8 = vunpack.c.h.bf16 %v1294_v4  ;;  %867 = vmatprep.subr.bf16.mxu0 %v1118_v2  ;;  %v1342_v26 = vld [vmem:[%s318_s25] sm:$0xff]  ;;  %s1418_s6 = scalar_lea.hbm %s1473_s4, %s849_s12  ;;  %s671_s5 = scalar_lea.sflag [#allocation4], %s1268_s22 }
  0x43   : > { %v1346_v27 = vrot.slane %v1342_v26, %v560_v25  ;;  %v575_v35 = vrot.slane %v1342_v26, %v574_v31  ;;  %v589_v49 = vrot.slane %v1342_v26, %v588_v42  ;;  %v603_v54 = vrot.slane %v1342_v26, %v602_v50  ;;  %s1029_s7 = scalar_lea.vmem %s1420_s13, 256  ;;  %p1481_p11 = scmp.ne.s32.totalorder %s1477_s28, 0 }
  0x44   : > { %325 = vmax.xlane.f32.xlu0 %v852_v5  ;;  %p1030_p8 = scmp.ne.s32.totalorder %s1420_s13, %s1029_s7  ;;  %s1128_s18 = smov [#allocation5]  }
  0x45   : > { %526 = vrot.lane.b32.xlu1 %v1298_v6, %s1119_s9  ;;  %868 = vmatpush3.bf16.msra.mxu0 %v977_v10  ;;  %s1033_s8 = sshll.u32 %s1128_s18, 4  ;;  %s1034_s8 = int_to_ptr.vmem [resolvable:$false] %s1033_s8 }
  0x46   : > { %869 = vmatprep.subr.bf16.mxu0 %v1118_v2  ;;  %p1031_p0 = pnand %p1030_p8, %p1481_p11  ;;  %s1035_s9 = scalar_lea.vmem %s1034_s8, 512 }
  0x47   : > { %p1036_p13 = scmp.lt.s32.totalorder %s1420_s13, %s1034_s8  ;;  %p1037_p2 = scmp.lt.s32.totalorder %s1035_s9, %s1029_s7 }
  0x48   : > { %327 = vmax.xlane.f32.xlu0 %v853_v8  ;;  %p1032_p6 = pneg %p1031_p0 }
  0x49   : > { %551 = vperm.xlu1 %961, %v1292_v3   ;;  %870 = vmatpush3.bf16.msra.mxu0 %v978_v12  ;;  %p1038_p5 = por %p1037_p2, %p1036_p13 }
  0x4a   : > { %871 = vmatprep.subr.bf16.mxu0 %v1118_v2 }
  0x4b   : > { %p1039_p4 = pnand %p1038_p5, %p1032_p6 }
  0x4d   : > { %555 = vperm.xlu1 %961, %v1298_v6   ;;  %872 = vmatpush3.bf16.msra.mxu0 %v979_v13 }
  0x4e   : > { %873 = vmatprep.subr.bf16.mxu0 %v1118_v2 }
  0x51   : > { %962 = vset.pattern.permute.xlu1 %v1120_v11  ;;  %874 = vmatpush3.bf16.msra.mxu0 %v980_v14 }
  0x52   : > { %565 = vperm.xlu1 %962, %v1292_v3   ;;  %875 = vmatprep.subr.bf16.mxu0 %v1118_v2 }
  0x55   : > { %876 = vmatpush3.bf16.msra.mxu0 %v981_v16 }
  0x56   : > { %569 = vperm.xlu1 %962, %v1298_v6   ;;  %877 = vmatprep.subr.bf16.mxu0 %v1118_v2 }
  0x59   : > { %878 = vmatpush3.bf16.msra.mxu0 %v982_v18  ;;  %v1125_v18 = vmov 1  }
  0x5a   : > { %963 = vset.pattern.permute.xlu1 %v1121_v15 }
  0x5b   : > { %579 = vperm.xlu1 %963, %v1292_v3  }
  0x5e   : > { %454 = vperm.xlu0 %965, %v1292_v3  }
  0x5f   : > { %964 = vset.pattern.permute.xlu1 %v1123_v17 }
  0x60   : > { %593 = vperm.xlu1 %964, %v1292_v3  }
  0x62   : > { %966 = vset.pattern.permute.xlu0 %v1121_v15 }
  0x64   : > { %597 = vperm.xlu1 %964, %v1298_v6  }
  0x68   : > { %967 = vset.pattern.permute.xlu1 %v1117_v1 }
  0xb3   : > { %v525_v19 = vpop.permute.xlu1 %524 }
  0xb4   : > { %v1325_v20 = vsub.f32 %v1292_v3, %v525_v19  ;;  %v1126_v19 = vmov 3  }
  0xb6   : > { %534 = vrot.lane.b32.xlu0 %v1325_v20, %s1124_s11 }
  0xb7   : > { %v527_v21 = vpop.permute.xlu1 %526 }
  0xb8   : > { %v1329_v22 = vsub.f32 %v1298_v6, %v527_v21  ;;  %v1127_v21 = vmov 2  }
  0xba   : > { %536 = vrot.lane.b32.xlu1 %v1329_v22, %s1124_s11  ;;  %583 = vperm.xlu0 %966, %v1298_v6  }
  0xbe   : > { %459 = vperm.xlu1 %967, %v1298_v6  }
  0xc2   : > { %968 = vset.pattern.permute.xlu1 %v1121_v15 }
  0xc8   : > { %v552_v28 = vpop.permute.xlu1 %551 }
  0xc9   : > { %v562_v29 = vmax.f32 %v552_v28, %v1346_v27  ;;  %v640_v30 = vmin.f32 %v552_v28, %v1346_v27 }
  0xcc   : > { %v1351_v32 = vpop.permute.xlu1 %555 }
  0xcd   : > { %v563_v33 = vmax.f32 %v1351_v32, %v1346_v27  ;;  %v641_v34 = vmin.f32 %v1351_v32, %v1346_v27 }
  0xd1   : > { %v326_v36 = vpop.xlane.xlu0 %325  ;;  %v566_v38 = vpop.permute.xlu1 %565 }
  0xd2   : > { %v329_v37 = vsub.f32 %v852_v5, %v326_v36  ;;  %v576_v39 = vmax.f32 %v566_v38, %v575_v35  ;;  %v642_v40 = vmin.f32 %v566_v38, %v575_v35 }
  0xd4   : > { %v331_v41 = vmul.f32 1.442695, %v329_v37 }
  0xd5   : > { %v328_v43 = vpop.xlane.xlu0 %327  ;;  %v570_v45 = vpop.permute.xlu1 %569 }
  0xd6   : > { %983 = vpow2.f32 %v331_v41  ;;  %v330_v44 = vsub.f32 %v853_v8, %v328_v43  ;;  %v577_v46 = vmax.f32 %v570_v45, %v575_v35  ;;  %v643_v47 = vmin.f32 %v570_v45, %v575_v35 }
  0xd7   : > { %v464_v41 = vsub.s32 0, %v1333_v24  ;;  %v480_v45 = vsub.s32 1, %v1333_v24 }
  0xd8   : > { %v333_v48 = vmul.f32 1.442695, %v330_v44 }
  0xda   : > { %985 = vpow2.f32 %v333_v48  ;;  %v580_v51 = vpop.permute.xlu1 %579 }
  0xdb   : > { %v590_v52 = vmin.f32 %v580_v51, %v589_v49  ;;  %v644_v53 = vmax.f32 %v580_v51, %v589_v49 }
  0xdd   : > { %v606_v55 = vsub.f32 %v590_v52, %v562_v29  ;;  %v648_v56 = vsub.f32 %v644_v53, %v640_v30  ;;  %v1372_v12 = vpop.permute.xlu0 %454 }
  0xdf   : > { %v594_v58 = vpop.permute.xlu1 %593  ;;  %v608_v61 = vmax.f32 %v606_v55, 0.0  ;;  %v481_v55 = vrot.slane %v1342_v26, %v480_v45 }
  0xe0   : > { %v984_v57 = vpop.eup %983  ;;  %v604_v59 = vmin.f32 %v594_v58, %v603_v54  ;;  %v646_v60 = vmax.f32 %v594_v58, %v603_v54 }
  0xe1   : > { %335 = vadd.xlane.f32.xlu0 %v984_v57 }
  0xe2   : > { %v610_v62 = vsub.f32 %v604_v59, %v576_v39  ;;  %v650_v63 = vsub.f32 %v646_v60, %v642_v40 }
  0xe3   : > { %v598_v1 = vpop.permute.xlu1 %597 }
  0xe4   : > { %v986_v0 = vpop.eup %985  ;;  %v612_v4 = vmax.f32 %v610_v62, 0.0  ;;  %v1368_v5 = vmul.f32 %v650_v63, %v648_v56  ;;  %v605_v7 = vmin.f32 %v598_v1, %v603_v54  ;;  %v647_v8 = vmax.f32 %v598_v1, %v603_v54 }
  0xe5   : > { %v341_v2 = vpack.c.bf16 %v986_v0, %v984_v57  ;;  %337 = vadd.xlane.f32.xlu1 %v986_v0  ;;  %v498_v54 = vsub.s32 2, %v1333_v24 }
  0xe6   : > { %v611_v9 = vsub.f32 %v605_v7, %v577_v46  ;;  %v1370_v10 = vmul.f32 %v612_v4, %v608_v61  ;;  %v651_v11 = vsub.f32 %v647_v8, %v643_v47 }
  0xe7   : > { %880 = vmatmul.mubr.bf16.vlgmr.msra.gmra.mrb[0].mxu0 %v341_v2  ;;  %v499_v1 = vrot.slane %v1342_v26, %v498_v54 }
  0xe8   : > { %v613_v29 = vmax.f32 %v611_v9, 0.0 }
 0x128   : > { %v535_v13 = vpop.permute.xlu0 %534 }
 0x129   : > { %v540_v14 = vmul.f32 %v535_v13, %v1325_v20 }
 0x12b   : > { %618 = vperm.xlu0 %966, %v540_v14  }
 0x12c   : > { %v537_v16 = vpop.permute.xlu1 %536 }
 0x12d   : > { %v541_v17 = vmul.f32 %v537_v16, %v1329_v22 }
 0x12f   : > { %623 = vperm.xlu1 %968, %v541_v17   ;;  %970 = vset.pattern.permute.xlu0 %v1125_v18 }
 0x130   : > { %475 = vperm.xlu0 %970, %v1298_v6  }
 0x133   : > { %969 = vset.pattern.permute.xlu1 %v1125_v18 }
 0x134   : > { %471 = vperm.xlu1 %969, %v1292_v3   ;;  %972 = vset.pattern.permute.xlu0 %v1126_v19 }
 0x135   : > { %507 = vperm.xlu0 %972, %v1292_v3  }
 0x138   : > { %971 = vset.pattern.permute.xlu1 %v1127_v21 }
 0x139   : > { %489 = vperm.xlu1 %971, %v1292_v3   ;;  %v584_v20 = vpop.permute.xlu0 %583  ;;  %974 = vset.pattern.permute.xlu0 %v1121_v15  ;;  %v543_v3 = vrot.slane %v1342_v26, 6 }
 0x13a   : > { %v591_v22 = vmin.f32 %v584_v20, %v589_v49  ;;  %v645_v23 = vmax.f32 %v584_v20, %v589_v49  ;;  %v516_v49 = vsub.s32 3, %v1333_v24 }
 0x13b   : > { %v545_v15 = vsub.f32 %v1342_v26, %v543_v3 }
 0x13c   : > { %v607_v25 = vsub.f32 %v591_v22, %v563_v33  ;;  %v649_v28 = vsub.f32 %v645_v23, %v641_v34  ;;  %v656_v33 = vadd.f32 1e-08, %v1368_v5  ;;  %v517_v59 = vrot.slane %v1342_v26, %v516_v49 }
 0x13d   : > { %493 = vperm.xlu1 %971, %v1298_v6   ;;  %v547_v36 = vrot.slane %v545_v15, 1  ;;  %v1394_v27 = vpop.permute.xlu1 %459 }
 0x13e   : > { %v609_v30 = vmax.f32 %v607_v25, 0.0  ;;  %v653_v31 = vmul.f32 %v651_v11, %v649_v28  ;;  %987 = vrcp.f32 %v656_v33 }
 0x13f   : > { %v549_v37 = vmul.f32 %v547_v36, %v545_v15 }
 0x140   : > { %v1388_v35 = vmul.f32 %v613_v29, %v609_v30  ;;  %v657_v32 = vadd.f32 1e-08, %v653_v31 }
 0x141   : > { %973 = vset.pattern.permute.xlu1 %v1126_v19  ;;  %v629_v38 = vrot.slane %v549_v37, %v588_v42  ;;  %v465_v42 = vrot.slane %v1342_v26, %v464_v41 }
 0x142   : > { %511 = vperm.xlu1 %973, %v1298_v6   ;;  %989 = vrcp.f32 %v657_v32 }
 0x143   : > { %v466_v63 = vsub.f32 %v1372_v12, %v465_v42  ;;  %v467_v12 = vsub.f32 %v1394_v27, %v465_v42 }
 0x145   : > { %v469_v3 = vand.u32 2147483647, %v467_v12 }
 0x148   : > { %v988_v50 = vpop.eup %987 }
 0x14c   : > { %v990_v60 = vpop.eup %989 }
 0x16e   : > { %v336_v34 = vpop.xlane.xlu0 %335 }
 0x172   : > { %v338_v39 = vpop.xlane.xlu1 %337 }
 0x1aa   : > { %v619_v40 = vpop.permute.xlu0 %618 }
 0x1ab   : > { %v630_v6 = vadd.f32 %v629_v38, %v619_v40 }
 0x1ad   : > { %v632_v43 = vsub.f32 %v630_v6, %v1370_v10 }
 0x1ae   : > { %v624_v44 = vpop.permute.xlu1 %623 }
 0x1af   : > { %v634_v46 = vadd.f32 1e-08, %v632_v43  ;;  %v654_v47 = vsub.f32 %v1368_v5, %v632_v43  ;;  %v631_v48 = vadd.f32 %v629_v38, %v624_v44  ;;  %v476_v51 = vpop.permute.xlu0 %475  ;;  %v468_v5 = vand.u32 2147483647, %v466_v63 }
 0x1b0   : > { %v483_v9 = vsub.f32 %v476_v51, %v481_v55 }
 0x1b1   : > { %991 = vrcp.f32 %v634_v46  ;;  %v660_v52 = vmul.f32 %v988_v50, %v654_v47  ;;  %v633_v53 = vsub.f32 %v631_v48, %v1388_v35 }
 0x1b2   : > { %993 = vrcp.f32 %v336_v34  ;;  %v485_v28 = vand.u32 2147483647, %v483_v9 }
 0x1b3   : > { %v635_v56 = vadd.f32 1e-08, %v633_v53  ;;  %v655_v57 = vsub.f32 %v653_v31, %v633_v53  ;;  %v472_v58 = vpop.permute.xlu1 %471 }
 0x1b4   : > { %v482_v61 = vsub.f32 %v472_v58, %v481_v55  ;;  %v508_v62 = vpop.permute.xlu0 %507 }
 0x1b5   : > { %995 = vrcp.f32 %v635_v56  ;;  %v661_v0 = vmul.f32 %v990_v60, %v655_v57  ;;  %v518_v4 = vsub.f32 %v508_v62, %v517_v59 }
 0x1b6   : > { %v484_v2 = vand.u32 2147483647, %v482_v61  ;;  %997 = vrcp.f32 %v338_v39 }
 0x1b7   : > { %v520_v17 = vand.u32 2147483647, %v518_v4 }
 0x1b8   : > { %v490_v24 = vpop.permute.xlu1 %489  ;;  %v486_v14 = vadd.f32 %v484_v2, %v468_v5 }
 0x1b9   : > { %v500_v7 = vsub.f32 %v490_v24, %v499_v1 }
 0x1ba   : > { %v440_v8 = vpop.f32.mrb[0].mxu0 }
 0x1bb   : > { %v881_v11 = vpop.f32.mrb[1].mxu0  ;;  %v992_v13 = vpop.eup %991  ;;  %v502_v16 = vand.u32 2147483647, %v500_v7 }
 0x1bc   : > { %v443_v18 = vpop.f32.mrb[2].mxu0  ;;  %v638_v19 = vmul.f32 %v992_v13, %v1370_v10  ;;  %v494_v26 = vpop.permute.xlu1 %493  ;;  %v487_v10 = vadd.f32 %v485_v28, %v469_v3 }
 0x1bd   : > { %v882_v21 = vpop.f32.mrb[3].mxu0  ;;  %v504_v20 = vadd.f32 %v502_v16, %v486_v14  ;;  %v501_v22 = vsub.f32 %v494_v26, %v499_v1  ;;  %v994_v23 = vpop.eup %993 }
 0x1be   : > { %v662_v25 = vsub.f32 %v660_v52, %v638_v19  ;;  %v447_v30 = vmul.f32 %v994_v23, %v440_v8 }
 0x1bf   : > { %v996_v29 = vpop.eup %995  ;;  %v522_v31 = vadd.f32 %v520_v17, %v504_v20  ;;  %v503_v36 = vand.u32 2147483647, %v501_v22 }
 0x1c0   : > { %v639_v15 = vmul.f32 %v996_v29, %v1388_v35  ;;  %v998_v40 = vpop.eup %997 }
 0x1c1   : > { %v664_v33 = vadd.f32 %v522_v31, %v447_v30  ;;  %v512_v37 = vpop.permute.xlu1 %511  ;;  %v505_v38 = vadd.f32 %v503_v36, %v487_v10  ;;  %v448_v6 = vmul.f32 %v998_v40, %v443_v18 }
 0x1c2   : > { %v663_v27 = vsub.f32 %v661_v0, %v639_v15  ;;  %v519_v32 = vsub.f32 %v512_v37, %v517_v59 }
 0x1c3   : > { %v666_v34 = vadd.f32 %v664_v33, %v662_v25 }
 0x1c4   : > { %v521_v39 = vand.u32 2147483647, %v519_v32 }
 0x1c5   : > { %668 = vst [vmem:[%s294_s10] sm:$0xff] %v666_v34 }
 0x1c6   : > { %v523_v41 = vadd.f32 %v521_v39, %v505_v38 }
 0x1c8   : > { %v665_v43 = vadd.f32 %v523_v41, %v448_v6 }
 0x1ca   : > { %v667_v35 = vadd.f32 %v665_v43, %v663_v27 }
 0x1cc   : > { %669 = vst [vmem:[%s294_s10 + $0x8] sm:$0xff] %v667_v35 }
 0x1cd   : > { %1042 = shalt.err (!%p1039_p4)
}
 0x1ce   : > { %s1043_s11 = scalar_lea.hbm %s1418_s6, 256  ;;  %s1047_s25 = scalar_lea.hbm %s1473_s4, 512 }
 0x1cf   : > { %p1044_p7 = scmp.ne.s32.totalorder %s1418_s6, %s1043_s11  ;;  %p1048_p1 = scmp.lt.u32.totalorder %s1418_s6, %s1473_s4 }
 0x1d0   : > { %p1049_p3 = scmp.lt.u32.totalorder %s1047_s25, %s1043_s11  ;;  %p1051_p8 = scmp.lt.u32.totalorder %s1043_s11, %s1418_s6 }
 0x1d1   : > { %p1045_p10 = pnand %p1044_p7, %p1481_p11 }
 0x1d2   : > { %p1050_p9 = por %p1049_p3, %p1048_p1 }
 0x1d3   : > { %p1046_p12 = pneg %p1045_p10 }
 0x1d4   : > { %p1052_p0 = por %p1051_p8, %p1050_p9 }
 0x1d6   : > { %p1053_p6 = pnand %p1052_p0, %p1046_p12 }
 0x1d8   : > { %1056 = shalt.err (!%p1053_p6)
}
 0x1d9   : > { %s1129_s12 = smov 128   ;;  %s1130_s27 = smov 8  }
 0x1da   : > { %885 = dma.vmem_to_hbm [thread:$0]  (%p1481_p11), %s1420_s13, 256, %s1418_s6, %s671_s5, %s1129_s12, %s1129_s12, %s1130_s27  }
 0x1db PF: > { %s701_s14 = sand.u32 1, %s1091_s15   ;;  %p1482_p13 = scmp.ne.s32.totalorder %s1478_s30, 0 }
 0x1dc   : > { %p1483_p2 = scmp.ge.s32.totalorder %s1111_s20, 2  ;;  %s702_s7 = scalar_lea.sflag [#allocation4], %s701_s14 }
 0x1de   : > { %p892_p5 = pnand %p1483_p2, %p1482_p13 }
 0x1e0   : > { %1086 = dma.done.wait (!%p892_p5), %s702_s7, 256  }
 0x1e1   : > { %1088 = vsyncadd (!%p892_p5), %s702_s7, 4294967040  ;;  %s20_s20 = sadd.s32 1, %s1111_s20   ;;  %s1484_s15 = smov %s1095_s16 }
 0x1e2   : > { %p17_p4 = scmp.ge.s32.totalorder %s20_s20, 4   ;;  %s1485_s16 = smov %s1099_s17 }
 0x1e3   : > { %s1486_s17 = smov %s1212_s29  ;;  %s1487_s18 = smov %s1107_s19 }
 0x1e4   : > { %s1488_s19 = smov %s1490_s23  ;;  %19 = sbr.rel (!%p17_p4) target bundleno = 6 (0x6), region = 90 }
 0x1eb   :  { %707 = vsyncpa [#allocation3], 1 }
 0x1ec   :  { %709 = vsyncpa [#allocation3 + $0x1], 1 }
 0x1ed   :  { %710 = vsyncpa [#allocation4], 1 }
 0x1ee   :  { %712 = vsyncpa [#allocation4 + $0x1], 1 }

</bundles_post_ra>
